<compile_context>
chip_gen: v5e
topology: v5e:2x2
jax: 0.10.0
libtpu: 0.0.40
codegen_flags: <defaults>
</compile_context>

<pallas_src>
import functools
import math

import jax
import jax.numpy as jnp
from jax.experimental import pallas as pl
from jax.experimental.pallas import tpu as pltpu


# ---------------------------------------------------------------------------
# Kernel 1: fused (M,K) @ (K,N) + bias (+ optional ReLU); bf16 in / f32 acc.
# Used for the synthetic-encoder 1x1 convs and the 2x2 transposed-conv matmul.
# ---------------------------------------------------------------------------
def _mm_bias_kernel(apply_relu, x_ref, w_ref, b_ref, o_ref):
    acc = jnp.dot(x_ref[...], w_ref[...], preferred_element_type=jnp.float32)
    acc = acc + b_ref[...]
    if apply_relu:
        acc = jnp.maximum(acc, 0.0)
    o_ref[...] = acc.astype(o_ref.dtype)


def _row_tile(M):
    """Row tile with no padding for the sizes that occur here; >=2 'parallel'
    tiles once M >= 512 so both v7x TensorCores are used."""
    if M <= 256:
        return M, M                      # single full-extent block, grid=1
    for t in (256, 128, 64, 32, 16, 8):
        if M % t == 0:
            return t, M
    tm = 128                             # generic fallback: pad to 128-multiple
    return tm, pl.cdiv(M, tm) * tm


def pallas_matmul_bias(x, w, b, *, relu=False, out_dtype=jnp.bfloat16):
    """x:(M,K) @ w:(K,N) + b:(N,), bf16 operands, f32 accumulation."""
    M, K = x.shape
    N = w.shape[1]
    x = x.astype(jnp.bfloat16)
    w = w.astype(jnp.bfloat16)
    b = b.astype(jnp.float32).reshape(1, N)
    tm, Mp = _row_tile(M)
    if Mp != M:
        x = jnp.pad(x, ((0, Mp - M), (0, 0)))
    # NOTE: weights here are tiny; at realistic U-Net widths the (K, N) operand
    # would need a K-tiled "arbitrary" reduction axis to stay inside v7x VMEM.
    out = pl.pallas_call(
        functools.partial(_mm_bias_kernel, relu),
        out_shape=jax.ShapeDtypeStruct((Mp, N), out_dtype),
        grid=(Mp // tm,),
        in_specs=[
            pl.BlockSpec((tm, K), lambda i: (i, 0)),   # activation row tile
            pl.BlockSpec((K, N), lambda i: (0, 0)),    # full (tiny) weight
            pl.BlockSpec((1, N), lambda i: (0, 0)),    # bias row
        ],
        out_specs=pl.BlockSpec((tm, N), lambda i: (i, 0)),
        compiler_params=pltpu.CompilerParams(dimension_semantics=("parallel",)),
    )(x, w, b)
    return out[:M] if Mp != M else out


# ---------------------------------------------------------------------------
# Kernel 2: fused decoder block tail
#   conv1(3x3 'same' on concat(up, residual)) + ReLU + conv2(3x3 'same') + ReLU
#   (+ optional fused final 1x1 conv).  One pallas_call per block, batch axis
#   as a parallel grid dimension, everything resident in VMEM.
# ---------------------------------------------------------------------------
def _block_tail_kernel(offsets, margin, rows, cout, has_final, *refs):
    if has_final:
        (up_ref, res_ref, mask_ref, c1wu_ref, c1wr_ref, c1b_ref,
         c2w_ref, c2b_ref, finw_ref, finb_ref, out_ref, scr_u, scr_r) = refs
    else:
        (up_ref, res_ref, mask_ref, c1wu_ref, c1wr_ref, c1b_ref,
         c2w_ref, c2b_ref, out_ref, scr_u, scr_r) = refs
        finw_ref = finb_ref = None

    # Stage zero-haloed copies of both conv1 operands in VMEM (halo rows emulate
    # the 'same' zero padding; per-tap masks kill row-wrap contamination).
    scr_u[...] = jnp.zeros_like(scr_u)
    scr_r[...] = jnp.zeros_like(scr_r)
    scr_u[pl.ds(margin, rows), :] = up_ref[...]
    scr_r[pl.ds(margin, rows), :] = res_ref[...]

    mask = mask_ref[...]                                      # (rows, 9) bf16

    # conv1: concat(up, res) realised as split-K weights -> no concat in HBM.
    acc = jnp.zeros((rows, cout), jnp.float32)
    for t, off in enumerate(offsets):
        m = mask[:, t:t + 1]
        a = scr_u[pl.ds(margin + off, rows), :] * m
        r = scr_r[pl.ds(margin + off, rows), :] * m
        acc = acc + jnp.dot(a, c1wu_ref[t], preferred_element_type=jnp.float32)
        acc = acc + jnp.dot(r, c1wr_ref[t], preferred_element_type=jnp.float32)
    h1 = jnp.maximum(acc + c1b_ref[...], 0.0).astype(scr_u.dtype)
    scr_u[pl.ds(margin, rows), :] = h1       # reuse halo buffer; halo stays zero

    # conv2 (3x3 'same') + ReLU.
    acc2 = jnp.zeros((rows, cout), jnp.float32)
    for t, off in enumerate(offsets):
        m = mask[:, t:t + 1]
        a = scr_u[pl.ds(margin + off, rows), :] * m
        acc2 = acc2 + jnp.dot(a, c2w_ref[t], preferred_element_type=jnp.float32)
    h2 = jnp.maximum(acc2 + c2b_ref[...], 0.0)

    if has_final:                            # fused final 1x1 conv (logits)
        out = jnp.dot(h2.astype(finw_ref.dtype), finw_ref[...],
                      preferred_element_type=jnp.float32) + finb_ref[...]
        out_ref[...] = out.astype(out_ref.dtype)
    else:
        out_ref[...] = h2.astype(out_ref.dtype)


def _tap_masks(Ho, Wo, dtype=jnp.bfloat16):
    """mask[r, t] = 1 iff neighbour (io+di, jo+dj) of output pixel r is in-bounds."""
    io = jnp.arange(Ho)[:, None, None]
    jo = jnp.arange(Wo)[None, :, None]
    di = jnp.array([d for d in (-1, 0, 1) for _ in (0, 1, 2)], jnp.int32)[None, None, :]
    dj = jnp.array([d for _ in (0, 1, 2) for d in (-1, 0, 1)], jnp.int32)[None, None, :]
    m = ((io + di >= 0) & (io + di < Ho) & (jo + dj >= 0) & (jo + dj < Wo))
    return m.reshape(Ho * Wo, 9).astype(dtype)


def fused_decoder_block(up_nhwc, res_nhwc, params, *, final_w=None, final_b=None):
    N, Ho, Wo, Cout = up_nhwc.shape
    rows = Ho * Wo
    margin = Wo + 1                                  # max |tap offset|
    offsets = [di * Wo + dj for di in (-1, 0, 1) for dj in (-1, 0, 1)]
    has_final = final_w is not None

    up2d = up_nhwc.reshape(N * rows, Cout).astype(jnp.bfloat16)
    res2d = res_nhwc.reshape(N * rows, Cout).astype(jnp.bfloat16)
    masks = _tap_masks(Ho, Wo)

    n_out = final_w.shape[1] if has_final else Cout
    out_dtype = jnp.float32 if has_final else jnp.bfloat16

    inputs = [up2d, res2d, masks,
              params["c1w_up"], params["c1w_res"], params["c1_b"],
              params["c2_w"], params["c2_b"]]
    in_specs = [
        pl.BlockSpec((rows, Cout), lambda i: (i, 0)),        # upsampled rows, image i
        pl.BlockSpec((rows, Cout), lambda i: (i, 0)),        # residual rows, image i
        pl.BlockSpec((rows, 9), lambda i: (0, 0)),           # tap validity masks
        pl.BlockSpec((9, Cout, Cout), lambda i: (0, 0, 0)),  # conv1 weight, up path
        pl.BlockSpec((9, Cout, Cout), lambda i: (0, 0, 0)),  # conv1 weight, skip path
        pl.BlockSpec((1, Cout), lambda i: (0, 0)),
        pl.BlockSpec((9, Cout, Cout), lambda i: (0, 0, 0)),  # conv2 weight
        pl.BlockSpec((1, Cout), lambda i: (0, 0)),
    ]
    if has_final:
        inputs += [final_w.astype(jnp.bfloat16),
                   final_b.astype(jnp.float32).reshape(1, n_out)]
        in_specs += [pl.BlockSpec((Cout, n_out), lambda i: (0, 0)),
                     pl.BlockSpec((1, n_out), lambda i: (0, 0))]

    out2d = pl.pallas_call(
        functools.partial(_block_tail_kernel, offsets, margin, rows, Cout, has_final),
        out_shape=jax.ShapeDtypeStruct((N * rows, n_out), out_dtype),
        grid=(N,),
        in_specs=in_specs,
        out_specs=pl.BlockSpec((rows, n_out), lambda i: (i, 0)),
        scratch_shapes=[pltpu.VMEM((rows + 2 * margin, Cout), jnp.bfloat16),
                        pltpu.VMEM((rows + 2 * margin, Cout), jnp.bfloat16)],
        compiler_params=pltpu.CompilerParams(dimension_semantics=("parallel",)),
    )(*inputs)
    return out2d.reshape(N, Ho, Wo, n_out)


# ---------------------------------------------------------------------------
# Conv wrappers (thin JAX glue around the Pallas hot paths)
# ---------------------------------------------------------------------------
def conv1x1(x, w, b, *, relu=False):
    N, H, W, Cin = x.shape
    Cout = w.shape[1]
    y = pallas_matmul_bias(x.reshape(N * H * W, Cin), w, b, relu=relu,
                           out_dtype=jnp.bfloat16)
    return y.reshape(N, H, W, Cout)


def conv_transpose2x2_s2(x, w_flat, b_flat):
    """x:(N,H,W,Cin) -> (N,2H,2W,Cout); matmul in Pallas, interleave in XLA."""
    N, H, W, Cin = x.shape
    Cout = w_flat.shape[1] // 4
    y = pallas_matmul_bias(x.reshape(N * H * W, Cin), w_flat, b_flat,
                           relu=False, out_dtype=jnp.bfloat16)
    y = y.reshape(N, H, W, 2, 2, Cout)
    # TODO(synk): interleave at store time via an out BlockSpec over the
    #             (N,H,2,W,2,C) factorisation instead of this XLA transpose.
    return jnp.transpose(y, (0, 1, 3, 2, 4, 5)).reshape(N, 2 * H, 2 * W, Cout)


def avgpool2(x):
    N, H, W, C = x.shape
    x32 = x.astype(jnp.float32).reshape(N, H // 2, 2, W // 2, 2, C)
    return x32.mean(axis=(2, 4)).astype(jnp.bfloat16)


# ---------------------------------------------------------------------------
# Deterministic parameter init (xavier_uniform weights, zero bias)
# ---------------------------------------------------------------------------
def xavier_uniform(key, shape, fan_in, fan_out):
    bound = math.sqrt(6.0 / (fan_in + fan_out))
    return jax.random.uniform(key, shape, jnp.float32, -bound, bound)


class PallasDecoder:
    """JAX/Pallas re-implementation of simclr.model.Decoder.forward."""

    def __init__(self, key, *, in_channels=3, filters=4, depth=2, num_classes=3):
        self.depth = depth
        self.num_classes = num_classes

        # synthetic encoder params (stand-in for the injected encoder)
        enc_ch = [in_channels] + [filters * 2 ** i for i in range(depth + 1)]
        self.enc = []
        for i in range(depth + 1):
            key, kw = jax.random.split(key)
            cin, cout = enc_ch[i], enc_ch[i + 1]
            self.enc.append((xavier_uniform(kw, (cin, cout), cin, cout).astype(jnp.bfloat16),
                             jnp.zeros((cout,), jnp.float32)))

        # decoder blocks: weights pre-flattened into the layouts the kernels use
        num_filters_out = filters * 2 ** depth
        self.blocks = []
        for _ in range(depth):
            nin = num_filters_out
            nout = nin // 2
            num_filters_out = nout
            key, k1, k2, k3 = jax.random.split(key, 4)
            up_w = xavier_uniform(k1, (2, 2, nin, nout), nout * 4, nin * 4)
            c1_w = xavier_uniform(k2, (3, 3, 2 * nout, nout), 2 * nout * 9, nout * 9)
            c2_w = xavier_uniform(k3, (3, 3, nout, nout), nout * 9, nout * 9)
            self.blocks.append(dict(
                # ConvTranspose2d(k=2,s=2) as a (Cin, 4*Cout) matmul, tap-major cols
                up_w=jnp.transpose(up_w, (2, 0, 1, 3)).reshape(nin, 4 * nout)
                         .astype(jnp.bfloat16),
                up_b=jnp.tile(jnp.zeros((nout,), jnp.float32), 4),
                # conv1 weight split along K (concat elimination), tap-major (9,Cin,Cout)
                c1w_up=c1_w[:, :, :nout, :].reshape(9, nout, nout).astype(jnp.bfloat16),
                c1w_res=c1_w[:, :, nout:, :].reshape(9, nout, nout).astype(jnp.bfloat16),
                c1_b=jnp.zeros((1, nout), jnp.float32),
                c2_w=c2_w.reshape(9, nout, nout).astype(jnp.bfloat16),
                c2_b=jnp.zeros((1, nout), jnp.float32),
            ))

        key, kf = jax.random.split(key)
        self.final_w = xavier_uniform(kf, (num_filters_out, num_classes),
                                      num_filters_out, num_classes)
        self.final_b = jnp.zeros((num_classes,), jnp.float32)

    # synthetic encoder: 1x1 conv (+ReLU) + 2x2 avg-pool pyramid
    def _encoder(self, x):
        feats, h = [], x
        for i, (w, b) in enumerate(self.enc):
            if i > 0:
                h = avgpool2(h)
            h = conv1x1(h, w, b, relu=True)
            feats.append(h)
        return h, feats

    def forward(self, x_nchw):
        x = jnp.transpose(x_nchw, (0, 2, 3, 1)).astype(jnp.bfloat16)   # NCHW -> NHWC
        x, encoder_output = self._encoder(x)
        n_blocks = len(self.blocks)
        for i, blk in enumerate(self.blocks):
            residual = encoder_output[-(i + 2)]
            up = conv_transpose2x2_s2(x, blk["up_w"], blk["up_b"])
            is_last = i == n_blocks - 1
            x = fused_decoder_block(
                up, residual, blk,
                final_w=self.final_w if is_last else None,
                final_b=self.final_b if is_last else None)
        if n_blocks == 0:                              # depth==0 fallback
            N, H, W, C = x.shape
            x = pallas_matmul_bias(x.reshape(N * H * W, C), self.final_w,
                                   self.final_b, relu=False,
                                   out_dtype=jnp.float32).reshape(N, H, W, -1)
        return jnp.transpose(x.astype(jnp.float32), (0, 3, 1, 2))      # NHWC -> NCHW


if __name__ == "__main__":
    key = jax.random.PRNGKey(0)
    k_x, k_p = jax.random.split(key)

    # small config: batch=2, in_channels=3, spatial=16, filters=4, depth=2, classes=3
    x = jax.random.normal(k_x, (2, 3, 16, 16), jnp.float32)

    dec = PallasDecoder(k_p, in_channels=3, filters=4, depth=2, num_classes=3)
    out = jax.block_until_ready(dec.forward(x))

    assert out.shape == (2, 3, 16, 16), out.shape
    assert jnp.all(jnp.isfinite(out))
    print("KERNEL_OK")
</pallas_src>

<mosaic_0001>
module attributes {stable_mosaic.version = 11 : i64} {
  func.func @_mm_bias_kernel(%arg0: i32, %arg1: memref<256x3xbf16, #tpu.memory_space<vmem>>, %arg2: memref<3x4xbf16, #tpu.memory_space<vmem>>, %arg3: memref<1x4xf32, #tpu.memory_space<vmem>>, %arg4: memref<256x4xbf16, #tpu.memory_space<vmem>>) attributes {dimension_semantics = [#tpu.dimension_semantics<parallel>], iteration_bounds = array<i64: 2>, scalar_prefetch = 0 : i64, scratch_operands = 0 : i64, tpu.core_type = #tpu.core_type<tc>, window_params = [{transform_indices = @transform_0, window_bounds = array<i64: 256, 3>}, {pipeline_mode = #tpu.pipeline_mode<synchronous>, transform_indices = @transform_1, window_bounds = array<i64: 3, 4>}, {pipeline_mode = #tpu.pipeline_mode<synchronous>, transform_indices = @transform_2, window_bounds = array<i64: 1, 4>}, {transform_indices = @transform_3, window_bounds = array<i64: 256, 4>}]} {
    %c0 = arith.constant 0 : index
    %c0_0 = arith.constant 0 : index
    %0 = vector.load %arg1[%c0, %c0_0] : memref<256x3xbf16, #tpu.memory_space<vmem>>, vector<256x3xbf16>
    %c0_1 = arith.constant 0 : index
    %c0_2 = arith.constant 0 : index
    %1 = vector.load %arg2[%c0_1, %c0_2] : memref<3x4xbf16, #tpu.memory_space<vmem>>, vector<3x4xbf16>
    %cst = arith.constant dense<0.000000e+00> : vector<256x4xf32>
    %2 = tpu.matmul %0, %1, %cst {dimension_numbers = #tpu.dot_dimension_numbers<[1], [0], [0], [1], [0, 0, 1, 1], [], []>} : vector<256x3xbf16>, vector<3x4xbf16>, vector<256x4xf32> -> vector<256x4xf32>
    %c0_3 = arith.constant 0 : index
    %c0_4 = arith.constant 0 : index
    %3 = vector.load %arg3[%c0_3, %c0_4] : memref<1x4xf32, #tpu.memory_space<vmem>>, vector<1x4xf32>
    %4 = vector.broadcast %3 : vector<1x4xf32> to vector<256x4xf32>
    %5 = arith.addf %2, %4 : vector<256x4xf32>
    %cst_5 = arith.constant 0.000000e+00 : f32
    %6 = vector.broadcast %cst_5 : f32 to vector<256x4xf32>
    %7 = arith.maximumf %5, %6 : vector<256x4xf32>
    %8 = arith.truncf %7 : vector<256x4xf32> to vector<256x4xbf16>
    %c0_6 = arith.constant 0 : index
    %c0_7 = arith.constant 0 : index
    %9 = vector.load %arg4[%c0_6, %c0_7] : memref<256x4xbf16, #tpu.memory_space<vmem>>, vector<256x4xbf16>
    tpu.vector_store %arg4[%c0_6, %c0_7], %8 {strides = array<i32>} : memref<256x4xbf16, #tpu.memory_space<vmem>>, vector<256x4xbf16>,
    return
  }
  func.func @transform_0(%arg0: i32) -> (i32, i32) {
    %c0_i32 = arith.constant 0 : i32
    %c0_i32_0 = arith.constant 0 : i32
    return %arg0, %c0_i32 : i32, i32
  }
  func.func @transform_1(%arg0: i32) -> (i32, i32) {
    %c0_i32 = arith.constant 0 : i32
    %c0_i32_0 = arith.constant 0 : i32
    %c0_i32_1 = arith.constant 0 : i32
    return %c0_i32, %c0_i32_0 : i32, i32
  }
  func.func @transform_2(%arg0: i32) -> (i32, i32) {
    %c0_i32 = arith.constant 0 : i32
    %c0_i32_0 = arith.constant 0 : i32
    %c0_i32_1 = arith.constant 0 : i32
    return %c0_i32, %c0_i32_0 : i32, i32
  }
  func.func @transform_3(%arg0: i32) -> (i32, i32) {
    %c0_i32 = arith.constant 0 : i32
    %c0_i32_0 = arith.constant 0 : i32
    return %arg0, %c0_i32 : i32, i32
  }
}

</mosaic_0001>

<bundles_post_ra>
// kernel: tpu_custom_call.1
= control target key start
LH: loop header
LB: loop body
LE: loop exit
PB: predicated region body
PF: predicated region fallthrough
CT: control target
= control target key end

     0   :  { %s739_s12 = smov 0   ;;  %s885_s0 = inlined_call_operand.vmem [shape: bf16[512,3], index: 0, kind: input, shape index: {}]   ;;  %s886_s1 = inlined_call_operand.vmem [shape: bf16[3,4], index: 1, kind: input, shape index: {}]   ;;  %s887_s2 = inlined_call_operand.vmem [shape: f32[1,4], index: 2, kind: input, shape index: {}]   ;;  %s888_s3 = inlined_call_operand.vmem [shape: bf16[512,4], index: 3, kind: output, shape index: {}]  }
   0x1 LB: > { %s590_s13 = sadd.s32 4294967295, %s716_s12   ;;  %p594_p0 = scmp.ge.s32.totalorder %s716_s12, 1  ;;  %s716_s12 = sphi %s739_s12, %s13_s12  }
   0x2   : > { %p138_p1 = scmp.lt.s32.totalorder %s716_s12, 3 }
   0x4   : > { %p139_p2 = pnand %p594_p0, %p138_p1 }
   0x5   : > { %s595_s16 = sshll.u32 (!%p139_p2), %s590_s13, 5 }
   0x6   : > { %142 = sbr.rel (%p139_p2) target bundleno = 216 (0xd8), region = 32  ;;  %p163_p3 = scmp.lt.s32.totalorder (!%p139_p2), %s595_s16, 63 }
   0xb   : > { %v207_v0 = vld [vmem:[%s886_s1] sm:$0x3]  ;;  %vm341_vm0 = vcmask 1040384   ;;  %vm342_vm1 = vcmask 1041408   ;;  %v718_v1 = vmov 65535   ;;  %s890_s16 = smov (!%p163_p3, %s595_s16), 63 }
   0xc   : > { %v343_v2 = vsel %vm341_vm0, 4294967295, %v718_v1  ;;  %s596_s17 = sshll.u32 %s890_s16, 2  ;;  %vm292_vm2 = vcmask 23552   ;;  %v777_v21 = vld [vmem:[%s887_s2] ss:$0 sm:$0xff]  ;;  %vm501_vm3 = vcmask 27648  }
   0xd   : > { %v344_v3 = vsel %vm342_vm1, %v343_v2, 0  ;;  %s166_s20 = scalar_lea.vmem %s885_s0, %s596_s17  ;;  %s786_s25 = scalar_lea.vmem %s888_s3, %s596_s17 }
   0xe   : > { %v346_v4 = vand.u32 %v344_v3, %v207_v0  ;;  %v681_v5 = vld [vmem:[%s166_s20] sm:$0xff]  ;;  %v682_v9 = vld [vmem:[%s166_s20 + $0x8] sm:$0xff]  ;;  %v683_v13 = vld [vmem:[%s166_s20 + $0x10] sm:$0xff] }
   0xf   : > { %v685_v6 = vld [vmem:[%s166_s20 + $0x20] sm:$0xff]  ;;  %v686_v10 = vld [vmem:[%s166_s20 + $0x28] sm:$0xff]  ;;  %v687_v14 = vld [vmem:[%s166_s20 + $0x30] sm:$0xff] }
  0x10   : > { %355 = vmatpush.bf16.msra.mxu0 %v346_v4  ;;  %697 = vmatpush.bf16.msra.mxu1 %v346_v4  ;;  %v689_v7 = vld [vmem:[%s166_s20 + $0x40] sm:$0xff]  ;;  %v690_v11 = vld [vmem:[%s166_s20 + $0x48] sm:$0xff]  ;;  %v691_v15 = vld [vmem:[%s166_s20 + $0x50] sm:$0xff] }
  0x11   : > { %698 = vmatpush.bf16.msra.mxu2 %v346_v4  ;;  %699 = vmatpush.bf16.msra.mxu3 %v346_v4  ;;  %v693_v8 = vld [vmem:[%s166_s20 + $0x60] sm:$0xff]  ;;  %v694_v12 = vld [vmem:[%s166_s20 + $0x68] sm:$0xff]  ;;  %v695_v16 = vld [vmem:[%s166_s20 + $0x70] sm:$0xff] }
  0x12   : > { %v684_v17 = vld [vmem:[%s166_s20 + $0x18] sm:$0xff] }
  0x13   : > { %663 = vmatmul.msk.bf16.vlgmr.msra.gmra.mxu0 %vm292_vm2, %v681_v5  ;;  %667 = vmatmul.msk.bf16.vlgmr.msra.gmra.mxu1 %vm292_vm2, %v685_v6  ;;  %v688_v18 = vld [vmem:[%s166_s20 + $0x38] sm:$0xff] }
  0x14   : > { %671 = vmatmul.msk.bf16.vlgmr.msra.gmra.mxu2 %vm292_vm2, %v689_v7  ;;  %675 = vmatmul.msk.bf16.vlgmr.msra.gmra.mxu3 %vm292_vm2, %v693_v8  ;;  %v692_v19 = vld [vmem:[%s166_s20 + $0x58] sm:$0xff] }
  0x15   : > { %v696_v20 = vld [vmem:[%s166_s20 + $0x78] sm:$0xff] }
  0x23   : > { %664 = vmatmul.msk.bf16.gmra.mxu0 %vm292_vm2, %v682_v9  ;;  %668 = vmatmul.msk.bf16.gmra.mxu1 %vm292_vm2, %v686_v10 }
  0x24   : > { %672 = vmatmul.msk.bf16.gmra.mxu2 %vm292_vm2, %v690_v11  ;;  %676 = vmatmul.msk.bf16.gmra.mxu3 %vm292_vm2, %v694_v12 }
  0x33   : > { %665 = vmatmul.msk.bf16.gmra.mxu0 %vm292_vm2, %v683_v13  ;;  %669 = vmatmul.msk.bf16.gmra.mxu1 %vm292_vm2, %v687_v14 }
  0x34   : > { %673 = vmatmul.msk.bf16.gmra.mxu2 %vm292_vm2, %v691_v15  ;;  %677 = vmatmul.msk.bf16.gmra.mxu3 %vm292_vm2, %v695_v16 }
  0x43   : > { %666 = vmatmul.msk.bf16.gmra.mxu0 %vm292_vm2, %v684_v17  ;;  %670 = vmatmul.msk.bf16.gmra.mxu1 %vm292_vm2, %v688_v18 }
  0x44   : > { %674 = vmatmul.msk.bf16.gmra.mxu2 %vm292_vm2, %v692_v19  ;;  %678 = vmatmul.msk.bf16.gmra.mxu3 %vm292_vm2, %v696_v20 }
  0x90   : > { %v357_v22 = vpop.f32.mrf.mxu0  ;;  %v377_v23 = vpop.f32.mrf.mxu1 }
  0x91   : > { %v358_v24 = vadd.f32 %v777_v21, %v357_v22  ;;  %v378_v25 = vadd.f32 %v777_v21, %v377_v23 }
  0x93   : > { %v437_v26 = vmax.f32 %v358_v24, 0.0  ;;  %v445_v27 = vmax.f32 %v378_v25, 0.0 }
  0x95   : > { %v469_v28 = vpack.c.bf16 %v437_v26, %v437_v26  ;;  %v477_v29 = vpack.c.bf16 %v445_v27, %v445_v27 }
  0x97   : > { %502 = vst.msk [vmem:[%s786_s25] sm:$0xf] %vm501_vm3, %v469_v28  ;;  %v397_v30 = vpop.f32.mrf.mxu2  ;;  %v417_v31 = vpop.f32.mrf.mxu3 }
  0x98   : > { %510 = vst.msk [vmem:[%s786_s25 + $0x20] sm:$0xf] %vm501_vm3, %v477_v29  ;;  %v398_v32 = vadd.f32 %v777_v21, %v397_v30  ;;  %v418_v33 = vadd.f32 %v777_v21, %v417_v31  ;;  %v359_v34 = vpop.f32.mrf.mxu0  ;;  %v379_v35 = vpop.f32.mrf.mxu1 }
  0x99   : > { %v360_v36 = vadd.f32 %v777_v21, %v359_v34  ;;  %v380_v37 = vadd.f32 %v777_v21, %v379_v35 }
  0x9a   : > { %v453_v38 = vmax.f32 %v398_v32, 0.0  ;;  %v461_v39 = vmax.f32 %v418_v33, 0.0 }
  0x9b   : > { %v438_v40 = vmax.f32 %v360_v36, 0.0  ;;  %v446_v41 = vmax.f32 %v380_v37, 0.0 }
  0x9c   : > { %v485_v42 = vpack.c.bf16 %v453_v38, %v453_v38  ;;  %v493_v43 = vpack.c.bf16 %v461_v39, %v461_v39 }
  0x9d   : > { %v470_v44 = vpack.c.bf16 %v438_v40, %v438_v40  ;;  %v478_v45 = vpack.c.bf16 %v446_v41, %v446_v41 }
  0x9e   : > { %518 = vst.msk [vmem:[%s786_s25 + $0x40] sm:$0xf] %vm501_vm3, %v485_v42 }
  0x9f   : > { %526 = vst.msk [vmem:[%s786_s25 + $0x60] sm:$0xf] %vm501_vm3, %v493_v43  ;;  %v399_v46 = vpop.f32.mrf.mxu2  ;;  %v419_v47 = vpop.f32.mrf.mxu3 }
  0xa0   : > { %503 = vst.msk [vmem:[%s786_s25 + $0x4] sm:$0xf] %vm501_vm3, %v470_v44  ;;  %v400_v48 = vadd.f32 %v777_v21, %v399_v46  ;;  %v420_v49 = vadd.f32 %v777_v21, %v419_v47  ;;  %v362_v50 = vpop.f32.mrf.mxu0  ;;  %v382_v51 = vpop.f32.mrf.mxu1 }
  0xa1   : > { %511 = vst.msk [vmem:[%s786_s25 + $0x24] sm:$0xf] %vm501_vm3, %v478_v45  ;;  %v363_v52 = vadd.f32 %v777_v21, %v362_v50  ;;  %v383_v53 = vadd.f32 %v777_v21, %v382_v51 }
  0xa2   : > { %v454_v54 = vmax.f32 %v400_v48, 0.0  ;;  %v462_v55 = vmax.f32 %v420_v49, 0.0 }
  0xa3   : > { %v439_v56 = vmax.f32 %v363_v52, 0.0  ;;  %v447_v57 = vmax.f32 %v383_v53, 0.0 }
  0xa4   : > { %v486_v58 = vpack.c.bf16 %v454_v54, %v454_v54  ;;  %v494_v59 = vpack.c.bf16 %v462_v55, %v462_v55 }
  0xa5   : > { %v471_v60 = vpack.c.bf16 %v439_v56, %v439_v56  ;;  %v479_v61 = vpack.c.bf16 %v447_v57, %v447_v57 }
  0xa6   : > { %519 = vst.msk [vmem:[%s786_s25 + $0x44] sm:$0xf] %vm501_vm3, %v486_v58 }
  0xa7   : > { %527 = vst.msk [vmem:[%s786_s25 + $0x64] sm:$0xf] %vm501_vm3, %v494_v59  ;;  %v402_v62 = vpop.f32.mrf.mxu2  ;;  %v422_v63 = vpop.f32.mrf.mxu3 }
  0xa8   : > { %504 = vst.msk [vmem:[%s786_s25 + $0x8] sm:$0xf] %vm501_vm3, %v471_v60  ;;  %v403_v0 = vadd.f32 %v777_v21, %v402_v62  ;;  %v423_v1 = vadd.f32 %v777_v21, %v422_v63  ;;  %v364_v2 = vpop.f32.mrf.mxu0  ;;  %v384_v3 = vpop.f32.mrf.mxu1 }
  0xa9   : > { %512 = vst.msk [vmem:[%s786_s25 + $0x28] sm:$0xf] %vm501_vm3, %v479_v61  ;;  %v365_v4 = vadd.f32 %v777_v21, %v364_v2  ;;  %v385_v5 = vadd.f32 %v777_v21, %v384_v3 }
  0xaa   : > { %v455_v6 = vmax.f32 %v403_v0, 0.0  ;;  %v463_v7 = vmax.f32 %v423_v1, 0.0 }
  0xab   : > { %v440_v8 = vmax.f32 %v365_v4, 0.0  ;;  %v448_v9 = vmax.f32 %v385_v5, 0.0 }
  0xac   : > { %v487_v10 = vpack.c.bf16 %v455_v6, %v455_v6  ;;  %v495_v11 = vpack.c.bf16 %v463_v7, %v463_v7 }
  0xad   : > { %v472_v12 = vpack.c.bf16 %v440_v8, %v440_v8  ;;  %v480_v13 = vpack.c.bf16 %v448_v9, %v448_v9 }
  0xae   : > { %520 = vst.msk [vmem:[%s786_s25 + $0x48] sm:$0xf] %vm501_vm3, %v487_v10 }
  0xaf   : > { %528 = vst.msk [vmem:[%s786_s25 + $0x68] sm:$0xf] %vm501_vm3, %v495_v11  ;;  %v404_v14 = vpop.f32.mrf.mxu2  ;;  %v424_v15 = vpop.f32.mrf.mxu3 }
  0xb0   : > { %505 = vst.msk [vmem:[%s786_s25 + $0xc] sm:$0xf] %vm501_vm3, %v472_v12  ;;  %v405_v16 = vadd.f32 %v777_v21, %v404_v14  ;;  %v425_v17 = vadd.f32 %v777_v21, %v424_v15  ;;  %v367_v18 = vpop.f32.mrf.mxu0  ;;  %v387_v19 = vpop.f32.mrf.mxu1 }
  0xb1   : > { %513 = vst.msk [vmem:[%s786_s25 + $0x2c] sm:$0xf] %vm501_vm3, %v480_v13  ;;  %v368_v20 = vadd.f32 %v777_v21, %v367_v18  ;;  %v388_v22 = vadd.f32 %v777_v21, %v387_v19 }
  0xb2   : > { %v456_v23 = vmax.f32 %v405_v16, 0.0  ;;  %v464_v24 = vmax.f32 %v425_v17, 0.0 }
  0xb3   : > { %v441_v25 = vmax.f32 %v368_v20, 0.0  ;;  %v449_v26 = vmax.f32 %v388_v22, 0.0 }
  0xb4   : > { %v488_v27 = vpack.c.bf16 %v456_v23, %v456_v23  ;;  %v496_v28 = vpack.c.bf16 %v464_v24, %v464_v24 }
  0xb5   : > { %v473_v29 = vpack.c.bf16 %v441_v25, %v441_v25  ;;  %v481_v30 = vpack.c.bf16 %v449_v26, %v449_v26 }
  0xb6   : > { %521 = vst.msk [vmem:[%s786_s25 + $0x4c] sm:$0xf] %vm501_vm3, %v488_v27 }
  0xb7   : > { %529 = vst.msk [vmem:[%s786_s25 + $0x6c] sm:$0xf] %vm501_vm3, %v496_v28  ;;  %v407_v31 = vpop.f32.mrf.mxu2  ;;  %v427_v32 = vpop.f32.mrf.mxu3 }
  0xb8   : > { %506 = vst.msk [vmem:[%s786_s25 + $0x10] sm:$0xf] %vm501_vm3, %v473_v29  ;;  %v408_v33 = vadd.f32 %v777_v21, %v407_v31  ;;  %v428_v34 = vadd.f32 %v777_v21, %v427_v32  ;;  %v369_v35 = vpop.f32.mrf.mxu0  ;;  %v389_v36 = vpop.f32.mrf.mxu1 }
  0xb9   : > { %514 = vst.msk [vmem:[%s786_s25 + $0x30] sm:$0xf] %vm501_vm3, %v481_v30  ;;  %v370_v37 = vadd.f32 %v777_v21, %v369_v35  ;;  %v390_v38 = vadd.f32 %v777_v21, %v389_v36 }
  0xba   : > { %v457_v39 = vmax.f32 %v408_v33, 0.0  ;;  %v465_v40 = vmax.f32 %v428_v34, 0.0 }
  0xbb   : > { %v442_v41 = vmax.f32 %v370_v37, 0.0  ;;  %v450_v42 = vmax.f32 %v390_v38, 0.0 }
  0xbc   : > { %v489_v43 = vpack.c.bf16 %v457_v39, %v457_v39  ;;  %v497_v44 = vpack.c.bf16 %v465_v40, %v465_v40 }
  0xbd   : > { %v474_v45 = vpack.c.bf16 %v442_v41, %v442_v41  ;;  %v482_v46 = vpack.c.bf16 %v450_v42, %v450_v42 }
  0xbe   : > { %522 = vst.msk [vmem:[%s786_s25 + $0x50] sm:$0xf] %vm501_vm3, %v489_v43 }
  0xbf   : > { %530 = vst.msk [vmem:[%s786_s25 + $0x70] sm:$0xf] %vm501_vm3, %v497_v44  ;;  %v409_v47 = vpop.f32.mrf.mxu2  ;;  %v429_v48 = vpop.f32.mrf.mxu3 }
  0xc0   : > { %507 = vst.msk [vmem:[%s786_s25 + $0x14] sm:$0xf] %vm501_vm3, %v474_v45  ;;  %v410_v49 = vadd.f32 %v777_v21, %v409_v47  ;;  %v430_v50 = vadd.f32 %v777_v21, %v429_v48  ;;  %v372_v51 = vpop.f32.mrf.mxu0  ;;  %v392_v52 = vpop.f32.mrf.mxu1 }
  0xc1   : > { %515 = vst.msk [vmem:[%s786_s25 + $0x34] sm:$0xf] %vm501_vm3, %v482_v46  ;;  %v373_v53 = vadd.f32 %v777_v21, %v372_v51  ;;  %v393_v54 = vadd.f32 %v777_v21, %v392_v52 }
  0xc2   : > { %v458_v55 = vmax.f32 %v410_v49, 0.0  ;;  %v466_v56 = vmax.f32 %v430_v50, 0.0 }
  0xc3   : > { %v443_v57 = vmax.f32 %v373_v53, 0.0  ;;  %v451_v58 = vmax.f32 %v393_v54, 0.0 }
  0xc4   : > { %v490_v59 = vpack.c.bf16 %v458_v55, %v458_v55  ;;  %v498_v60 = vpack.c.bf16 %v466_v56, %v466_v56 }
  0xc5   : > { %v475_v61 = vpack.c.bf16 %v443_v57, %v443_v57  ;;  %v483_v62 = vpack.c.bf16 %v451_v58, %v451_v58 }
  0xc6   : > { %523 = vst.msk [vmem:[%s786_s25 + $0x54] sm:$0xf] %vm501_vm3, %v490_v59 }
  0xc7   : > { %531 = vst.msk [vmem:[%s786_s25 + $0x74] sm:$0xf] %vm501_vm3, %v498_v60  ;;  %v412_v63 = vpop.f32.mrf.mxu2  ;;  %v432_v0 = vpop.f32.mrf.mxu3 }
  0xc8   : > { %508 = vst.msk [vmem:[%s786_s25 + $0x18] sm:$0xf] %vm501_vm3, %v475_v61  ;;  %v413_v1 = vadd.f32 %v777_v21, %v412_v63  ;;  %v433_v2 = vadd.f32 %v777_v21, %v432_v0  ;;  %v374_v3 = vpop.f32.mrf.mxu0  ;;  %v394_v4 = vpop.f32.mrf.mxu1 }
  0xc9   : > { %516 = vst.msk [vmem:[%s786_s25 + $0x38] sm:$0xf] %vm501_vm3, %v483_v62  ;;  %v375_v5 = vadd.f32 %v777_v21, %v374_v3  ;;  %v395_v6 = vadd.f32 %v777_v21, %v394_v4 }
  0xca   : > { %v459_v7 = vmax.f32 %v413_v1, 0.0  ;;  %v467_v8 = vmax.f32 %v433_v2, 0.0 }
  0xcb   : > { %v444_v9 = vmax.f32 %v375_v5, 0.0  ;;  %v452_v10 = vmax.f32 %v395_v6, 0.0 }
  0xcc   : > { %v491_v11 = vpack.c.bf16 %v459_v7, %v459_v7  ;;  %v499_v12 = vpack.c.bf16 %v467_v8, %v467_v8 }
  0xcd   : > { %v476_v13 = vpack.c.bf16 %v444_v9, %v444_v9  ;;  %v484_v14 = vpack.c.bf16 %v452_v10, %v452_v10 }
  0xce   : > { %524 = vst.msk [vmem:[%s786_s25 + $0x58] sm:$0xf] %vm501_vm3, %v491_v11 }
  0xcf   : > { %532 = vst.msk [vmem:[%s786_s25 + $0x78] sm:$0xf] %vm501_vm3, %v499_v12  ;;  %v414_v15 = vpop.f32.mrf.mxu2  ;;  %v434_v16 = vpop.f32.mrf.mxu3 }
  0xd0   : > { %509 = vst.msk [vmem:[%s786_s25 + $0x1c] sm:$0xf] %vm501_vm3, %v476_v13  ;;  %v415_v17 = vadd.f32 %v777_v21, %v414_v15  ;;  %v435_v18 = vadd.f32 %v777_v21, %v434_v16 }
  0xd1   : > { %517 = vst.msk [vmem:[%s786_s25 + $0x3c] sm:$0xf] %vm501_vm3, %v484_v14 }
  0xd2   : > { %v460_v19 = vmax.f32 %v415_v17, 0.0  ;;  %v468_v20 = vmax.f32 %v435_v18, 0.0 }
  0xd4   : > { %v492_v22 = vpack.c.bf16 %v460_v19, %v460_v19  ;;  %v500_v23 = vpack.c.bf16 %v468_v20, %v468_v20 }
  0xd6   : > { %525 = vst.msk [vmem:[%s786_s25 + $0x5c] sm:$0xf] %vm501_vm3, %v492_v22 }
  0xd7   : > { %533 = vst.msk [vmem:[%s786_s25 + $0x7c] sm:$0xf] %vm501_vm3, %v500_v23 }
  0xd8 PF: > { %s13_s12 = sadd.s32 1, %s716_s12  }
  0xd9   : > { %p10_p4 = scmp.ge.s32.totalorder %s13_s12, 4  }
  0xdb   :  { %12 = sbr.rel (!%p10_p4) target bundleno = 1 (0x1), region = 62 }

</bundles_post_ra>
